<compile_context>
chip_gen: v7x
topology: tpu7x:2x2x1
jax: 0.10.0
libtpu: 0.0.40
codegen_flags: <defaults>
</compile_context>

<pallas_src>
import functools
import math

import jax
import jax.numpy as jnp
from jax import lax
from jax.experimental import pallas as pl
from jax.experimental.pallas import tpu as pltpu

LEAKY_SLOPE = 0.01  # PyTorch nn.functional.leaky_relu default


def _fused_kernel(*refs, K, H, W, G, B, nch):
    """All conv layers for B images stacked along the row (matmul-M) axis.

    refs layout:
      x_ref              (B, H, W*C0)        lane-dense packed input images
      w_refs[0..L-1]     (K*W*Cin, W*Cout)   fused banded weights (bf16)
      b_refs[0..L-1]     (1, W*Cout)         lane-dense packed biases (f32)
      o_ref              (B, H, W*CL)        lane-dense packed output
      buf0, buf1         (Hbuf, W*Cmax)      f32 ping-pong halo buffers
    Row layout of the halo buffers (S = H + G, Hbuf = B*S + G):
      [G zero halo][img0: H rows][G zero gap][img1: H rows]...[last img][G zero halo]
    """
    L = len(nch) - 1
    pad = K // 2
    S = H + G
    M = B * S - G              # computed rows: all image interiors + inter-image gaps
    Hbuf = B * S + G
    c0 = nch[0]

    x_ref = refs[0]
    w_refs = refs[1:1 + L]
    b_refs = refs[1 + L:1 + 2 * L]
    o_ref = refs[1 + 2 * L]
    bufs = [refs[2 + 2 * L], refs[3 + 2 * L]]

    # Zero only the halo / gap rows: image interiors are fully overwritten each
    # step (by staging / every layer's store) for every column that is later
    # read, so full-buffer zero sweeps are unnecessary.
    zrow = jnp.zeros((G, bufs[0].shape[1]), jnp.float32)
    for buf in bufs:
        buf[0:G, :] = zrow
        buf[Hbuf - G:Hbuf, :] = zrow
    for j in range(B - 1):                      # gaps between stacked images
        bufs[0][G + j * S + H:G + (j + 1) * S, :] = zrow

    # Stage each image's packed rows into its 8-row-aligned interior of buf0.
    for j in range(B):
        bufs[0][G + j * S:G + j * S + H, 0:W * c0] = x_ref[j].astype(jnp.float32)

    # Which computed rows belong to an image (vs. an inter-image gap).  Gap
    # rows must be re-zeroed after bias+activation so they keep serving as the
    # next layer's zero padding.
    if B > 1:
        ridx = lax.broadcasted_iota(jnp.int32, (M, 1), 0)
        img_mask = ((ridx % S) < H).astype(jnp.float32)
    else:
        img_mask = None

    cur = 0
    for kl in range(L):
        cin, cout = nch[kl], nch[kl + 1]
        src = bufs[cur]

        # One deep matmul per layer: lane-concat the K row-shifted slices so the
        # contraction depth is K*W*cin; the column taps AND the zero column
        # padding live inside the banded weight matrix.  bf16 in, f32 acc.
        lhs = jnp.concatenate(
            [src[G - pad + kh:G - pad + kh + M, 0:W * cin] for kh in range(K)],
            axis=1).astype(w_refs[kl].dtype)
        acc = jnp.dot(lhs, w_refs[kl][...], preferred_element_type=jnp.float32)
        acc = acc + b_refs[kl][...]                       # (1, W*cout) broadcast

        if kl == 0:
            out = jnp.where(acc >= 0, acc, LEAKY_SLOPE * acc)
        elif kl < L - 1:
            acc = acc + src[G:G + M, 0:W * cin]           # residual (cin == cout)
            out = jnp.where(acc >= 0, acc, LEAKY_SLOPE * acc)
        else:
            out = jnp.clip(acc, -1.0, 1.0)

        if kl < L - 1:
            if img_mask is not None:
                out = out * img_mask                      # re-zero gap rows
            nxt = 1 - cur
            bufs[nxt][G:G + M, 0:W * cout] = out          # 8-row aligned store
            cur = nxt
        else:
            for j in range(B):                            # image rows only
                o_ref[j] = out[j * S:j * S + H].astype(o_ref.dtype)


def expand_params(params, W, K, compute_dtype=jnp.bfloat16):
    """Fold column taps + zero column padding of each conv into ONE fused
    banded matrix of shape (K*W*Cin, W*Cout) per layer (row taps stacked along
    the contraction axis); pack biases lane-dense.  Call ONCE, outside jit."""
    pad = K // 2
    wmats, bvecs = [], []
    for w_hwio, b in params:
        cin, cout = w_hwio.shape[2], w_hwio.shape[3]
        mats = []
        for kh in range(K):
            m = jnp.zeros((W * cin, W * cout), jnp.float32)
            for kw in range(K):
                # selection matrix: source column w + kw - pad feeds output col w
                sel = jnp.eye(W, W, k=pad - kw, dtype=jnp.float32)
                m = m + jnp.kron(sel, w_hwio[kh, kw].astype(jnp.float32))
            mats.append(m)
        wmats.append(jnp.concatenate(mats, axis=0).astype(compute_dtype))
        bvecs.append(jnp.tile(b.astype(jnp.float32), W).reshape(1, W * cout))
    return wmats, bvecs


@functools.partial(jax.jit, static_argnames=("K", "nch"))
def filter_iden_forward(x_nchw, wmats, bvecs, *, K, nch):
    """Pallas implementation of FilterIden.forward.  Input/output are NCHW.
    wmats / bvecs come from expand_params() (built once, outside this call)."""
    N, C0, H, W = x_nchw.shape
    L = len(nch) - 1
    pad = K // 2
    assert K % 2 == 1 and L >= 2 and C0 == nch[0]
    for kl in range(1, L - 1):                  # residual layers need cin == cout
        assert nch[kl] == nch[kl + 1]
    assert wmats[0].shape == (K * W * nch[0], W * nch[1]), "wmats built for a different W"
    CL = nch[-1]
    Cmax = max(nch[:-1])

    # Row-batch B images per grid step (matmul M ~= 128) while keeping >= 2
    # grid steps so a 2-TensorCore chip (v7x) keeps both cores busy.
    B = max(1, min(max(1, 128 // H), -(-N // 2)))
    Np = -(-N // B) * B
    G = ((pad + 7) // 8) * 8                    # sublane-aligned halo/gap rows
    Hbuf = B * (H + G) + G

    # lane-dense packing: NCHW -> NHWC -> (N, H, W*C)
    x_packed = jnp.transpose(x_nchw, (0, 2, 3, 1)).reshape(N, H, W * C0)
    if Np != N:
        x_packed = jnp.concatenate(
            [x_packed, jnp.zeros((Np - N, H, W * C0), x_packed.dtype)], axis=0)

    kernel = functools.partial(_fused_kernel, K=K, H=H, W=W, G=G, B=B, nch=nch)

    in_specs = [pl.BlockSpec((B, H, W * C0), lambda n: (n, 0, 0))]
    in_specs += [pl.BlockSpec(m.shape, lambda n: (0, 0)) for m in wmats]
    in_specs += [pl.BlockSpec(b.shape, lambda n: (0, 0)) for b in bvecs]

    out = pl.pallas_call(
        kernel,
        out_shape=jax.ShapeDtypeStruct((Np, H, W * CL), x_nchw.dtype),
        grid_spec=pltpu.PrefetchScalarGridSpec(
            num_scalar_prefetch=0,
            grid=(Np // B,),
            in_specs=in_specs,
            out_specs=pl.BlockSpec((B, H, W * CL), lambda n: (n, 0, 0)),
            scratch_shapes=[pltpu.VMEM((Hbuf, W * Cmax), jnp.float32),
                            pltpu.VMEM((Hbuf, W * Cmax), jnp.float32)],
        ),
        compiler_params=pltpu.CompilerParams(
            dimension_semantics=("parallel",)),
    )(x_packed, *wmats, *bvecs)

    out = out[:N]
    return jnp.transpose(out.reshape(N, H, W, CL), (0, 3, 1, 2))


def init_params(key, kernel, nch):
    """Deterministic init mimicking PyTorch Conv2d default (uniform +-1/sqrt(fan_in))."""
    params = []
    for kl in range(len(nch) - 1):
        cin, cout = nch[kl], nch[kl + 1]
        fan_in = cin * kernel * kernel
        bound = 1.0 / math.sqrt(fan_in)
        key, kw, kb = jax.random.split(key, 3)
        w = jax.random.uniform(
            kw, (kernel, kernel, cin, cout), jnp.float32, -bound, bound)  # HWIO
        b = jax.random.uniform(kb, (cout,), jnp.float32, -bound, bound)
        params.append((w, b))
    return params


def filter_iden_reference(x_nchw, params):
    """Pure-JAX reference (lax.conv) for correctness checking."""
    x = jnp.transpose(x_nchw, (0, 2, 3, 1))

    def conv(x, w, b):
        y = lax.conv_general_dilated(
            x, w, window_strides=(1, 1), padding="SAME",
            dimension_numbers=("NHWC", "HWIO", "NHWC"))
        return y + b

    def leaky(v):
        return jnp.where(v >= 0, v, LEAKY_SLOPE * v)

    nlayers = len(params)
    w, b = params[0]
    x = leaky(conv(x, w, b))
    for kl in range(1, nlayers - 1):
        w, b = params[kl]
        x = leaky(conv(x, w, b) + x)
    w, b = params[nlayers - 1]
    x = jnp.clip(conv(x, w, b), -1.0, 1.0)
    return jnp.transpose(x, (0, 3, 1, 2))


if __name__ == "__main__":
    key = jax.random.PRNGKey(0)
    kernel_size = 3
    nch = (4, 8, 8, 4)          # 3 conv layers: first / residual-middle / clamped-last
    N, H, W = 2, 16, 16

    key, kx = jax.random.split(key)
    x = jax.random.normal(kx, (N, nch[0], H, W), jnp.float32)  # NCHW like PyTorch

    params = init_params(key, kernel_size, list(nch))
    # Fused banded weights / packed biases are built ONCE, outside the jitted path.
    wmats, bvecs = expand_params(params, W, kernel_size)

    out = jax.block_until_ready(
        filter_iden_forward(x, wmats, bvecs, K=kernel_size, nch=nch))

    ref = filter_iden_reference(x, params)
    assert out.shape == (N, nch[-1], H, W)
    # bf16 MXU operands (f32 accumulate) -> slightly looser tolerance than pure f32.
    assert jnp.allclose(out, ref, atol=2e-2, rtol=2e-2), "mismatch vs reference"

    print("KERNEL_OK")
</pallas_src>

<mosaic_0001>
module attributes {stable_mosaic.version = 11 : i64} {
  func.func @_fused_kernel(%arg0: i32, %arg1: memref<1x16x64xf32, #tpu.memory_space<vmem>>, %arg2: memref<192x128xbf16, #tpu.memory_space<vmem>>, %arg3: memref<384x128xbf16, #tpu.memory_space<vmem>>, %arg4: memref<384x64xbf16, #tpu.memory_space<vmem>>, %arg5: memref<1x128xf32, #tpu.memory_space<vmem>>, %arg6: memref<1x128xf32, #tpu.memory_space<vmem>>, %arg7: memref<1x64xf32, #tpu.memory_space<vmem>>, %arg8: memref<1x16x64xf32, #tpu.memory_space<vmem>>, %arg9: memref<32x128xf32, #tpu.memory_space<vmem>>, %arg10: memref<32x128xf32, #tpu.memory_space<vmem>>) attributes {dimension_semantics = [#tpu.dimension_semantics<parallel>], iteration_bounds = array<i64: 2>, scalar_prefetch = 0 : i64, scratch_operands = 2 : i64, tpu.core_type = #tpu.core_type<tc>, window_params = [{transform_indices = @transform_0, window_bounds = array<i64: 1, 16, 64>}, {pipeline_mode = #tpu.pipeline_mode<synchronous>, transform_indices = @transform_1, window_bounds = array<i64: 192, 128>}, {pipeline_mode = #tpu.pipeline_mode<synchronous>, transform_indices = @transform_2, window_bounds = array<i64: 384, 128>}, {pipeline_mode = #tpu.pipeline_mode<synchronous>, transform_indices = @transform_3, window_bounds = array<i64: 384, 64>}, {pipeline_mode = #tpu.pipeline_mode<synchronous>, transform_indices = @transform_4, window_bounds = array<i64: 1, 128>}, {pipeline_mode = #tpu.pipeline_mode<synchronous>, transform_indices = @transform_5, window_bounds = array<i64: 1, 128>}, {pipeline_mode = #tpu.pipeline_mode<synchronous>, transform_indices = @transform_6, window_bounds = array<i64: 1, 64>}, {transform_indices = @transform_7, window_bounds = array<i64: 1, 16, 64>}]} {
    %cst = arith.constant 0.000000e+00 : f32
    %0 = vector.broadcast %cst : f32 to vector<8x128xf32>
    %c0 = arith.constant 0 : index
    %c0_0 = arith.constant 0 : index
    %1 = vector.load %arg9[%c0, %c0_0] : memref<32x128xf32, #tpu.memory_space<vmem>>, vector<8x128xf32>
    tpu.vector_store %arg9[%c0, %c0_0], %0 {strides = array<i32>} : memref<32x128xf32, #tpu.memory_space<vmem>>, vector<8x128xf32>,
    %c24 = arith.constant 24 : index
    %c0_1 = arith.constant 0 : index
    %2 = vector.load %arg9[%c24, %c0_1] : memref<32x128xf32, #tpu.memory_space<vmem>>, vector<8x128xf32>
    tpu.vector_store %arg9[%c24, %c0_1], %0 {strides = array<i32>} : memref<32x128xf32, #tpu.memory_space<vmem>>, vector<8x128xf32>,
    %c0_2 = arith.constant 0 : index
    %c0_3 = arith.constant 0 : index
    %3 = vector.load %arg10[%c0_2, %c0_3] : memref<32x128xf32, #tpu.memory_space<vmem>>, vector<8x128xf32>
    tpu.vector_store %arg10[%c0_2, %c0_3], %0 {strides = array<i32>} : memref<32x128xf32, #tpu.memory_space<vmem>>, vector<8x128xf32>,
    %c24_4 = arith.constant 24 : index
    %c0_5 = arith.constant 0 : index
    %4 = vector.load %arg10[%c24_4, %c0_5] : memref<32x128xf32, #tpu.memory_space<vmem>>, vector<8x128xf32>
    tpu.vector_store %arg10[%c24_4, %c0_5], %0 {strides = array<i32>} : memref<32x128xf32, #tpu.memory_space<vmem>>, vector<8x128xf32>,
    %c0_6 = arith.constant 0 : index
    %c0_7 = arith.constant 0 : index
    %c0_8 = arith.constant 0 : index
    %5 = vector.load %arg1[%c0_6, %c0_7, %c0_8] : memref<1x16x64xf32, #tpu.memory_space<vmem>>, vector<1x16x64xf32>
    %6 = vector.shape_cast %5 : vector<1x16x64xf32> to vector<16x64xf32>
    %c8 = arith.constant 8 : index
    %c0_9 = arith.constant 0 : index
    %7 = vector.load %arg9[%c8, %c0_9] : memref<32x128xf32, #tpu.memory_space<vmem>>, vector<16x64xf32>
    tpu.vector_store %arg9[%c8, %c0_9], %6 {strides = array<i32>} : memref<32x128xf32, #tpu.memory_space<vmem>>, vector<16x64xf32>,
    %c7 = arith.constant 7 : index
    %c0_10 = arith.constant 0 : index
    %8 = vector.load %arg9[%c7, %c0_10] : memref<32x128xf32, #tpu.memory_space<vmem>>, vector<16x64xf32>
    %c8_11 = arith.constant 8 : index
    %c0_12 = arith.constant 0 : index
    %9 = vector.load %arg9[%c8_11, %c0_12] : memref<32x128xf32, #tpu.memory_space<vmem>>, vector<16x64xf32>
    %c9 = arith.constant 9 : index
    %c0_13 = arith.constant 0 : index
    %10 = vector.load %arg9[%c9, %c0_13] : memref<32x128xf32, #tpu.memory_space<vmem>>, vector<16x64xf32>
    %11 = tpu.concatenate %8, %9, %10 in 1 : vector<16x64xf32>, vector<16x64xf32>, vector<16x64xf32> -> vector<16x192xf32>
    %12 = arith.truncf %11 : vector<16x192xf32> to vector<16x192xbf16>
    %c0_14 = arith.constant 0 : index
    %c0_15 = arith.constant 0 : index
    %13 = vector.load %arg2[%c0_14, %c0_15] : memref<192x128xbf16, #tpu.memory_space<vmem>>, vector<192x128xbf16>
    %cst_16 = arith.constant dense<0.000000e+00> : vector<16x128xf32>
    %14 = tpu.matmul %12, %13, %cst_16 {dimension_numbers = #tpu.dot_dimension_numbers<[1], [0], [0], [1], [0, 0, 1, 1], [], []>} : vector<16x192xbf16>, vector<192x128xbf16>, vector<16x128xf32> -> vector<16x128xf32>
    %c0_17 = arith.constant 0 : index
    %c0_18 = arith.constant 0 : index
    %15 = vector.load %arg5[%c0_17, %c0_18] : memref<1x128xf32, #tpu.memory_space<vmem>>, vector<1x128xf32>
    %16 = vector.broadcast %15 : vector<1x128xf32> to vector<16x128xf32>
    %17 = arith.addf %14, %16 : vector<16x128xf32>
    %cst_19 = arith.constant 0.000000e+00 : f32
    %18 = vector.broadcast %cst_19 : f32 to vector<16x128xf32>
    %19 = arith.cmpf oge, %17, %18 : vector<16x128xf32>
    %cst_20 = arith.constant 0.00999999977 : f32
    %20 = vector.broadcast %cst_20 : f32 to vector<16x128xf32>
    %21 = arith.mulf %20, %17 : vector<16x128xf32>
    %22 = arith.select %19, %17, %21 : vector<16x128xi1>, vector<16x128xf32>
    %c8_21 = arith.constant 8 : index
    %c0_22 = arith.constant 0 : index
    %23 = vector.load %arg10[%c8_21, %c0_22] : memref<32x128xf32, #tpu.memory_space<vmem>>, vector<16x128xf32>
    tpu.vector_store %arg10[%c8_21, %c0_22], %22 {strides = array<i32>} : memref<32x128xf32, #tpu.memory_space<vmem>>, vector<16x128xf32>,
    %c7_23 = arith.constant 7 : index
    %c0_24 = arith.constant 0 : index
    %24 = vector.load %arg10[%c7_23, %c0_24] : memref<32x128xf32, #tpu.memory_space<vmem>>, vector<16x128xf32>
    %c8_25 = arith.constant 8 : index
    %c0_26 = arith.constant 0 : index
    %25 = vector.load %arg10[%c8_25, %c0_26] : memref<32x128xf32, #tpu.memory_space<vmem>>, vector<16x128xf32>
    %c9_27 = arith.constant 9 : index
    %c0_28 = arith.constant 0 : index
    %26 = vector.load %arg10[%c9_27, %c0_28] : memref<32x128xf32, #tpu.memory_space<vmem>>, vector<16x128xf32>
    %27 = tpu.concatenate %24, %25, %26 in 1 : vector<16x128xf32>, vector<16x128xf32>, vector<16x128xf32> -> vector<16x384xf32>
    %28 = arith.truncf %27 : vector<16x384xf32> to vector<16x384xbf16>
    %c0_29 = arith.constant 0 : index
    %c0_30 = arith.constant 0 : index
    %29 = vector.load %arg3[%c0_29, %c0_30] : memref<384x128xbf16, #tpu.memory_space<vmem>>, vector<384x128xbf16>
    %cst_31 = arith.constant dense<0.000000e+00> : vector<16x128xf32>
    %30 = tpu.matmul %28, %29, %cst_31 {dimension_numbers = #tpu.dot_dimension_numbers<[1], [0], [0], [1], [0, 0, 1, 1], [], []>} : vector<16x384xbf16>, vector<384x128xbf16>, vector<16x128xf32> -> vector<16x128xf32>
    %c0_32 = arith.constant 0 : index
    %c0_33 = arith.constant 0 : index
    %31 = vector.load %arg6[%c0_32, %c0_33] : memref<1x128xf32, #tpu.memory_space<vmem>>, vector<1x128xf32>
    %32 = vector.broadcast %31 : vector<1x128xf32> to vector<16x128xf32>
    %33 = arith.addf %30, %32 : vector<16x128xf32>
    %c8_34 = arith.constant 8 : index
    %c0_35 = arith.constant 0 : index
    %34 = vector.load %arg10[%c8_34, %c0_35] : memref<32x128xf32, #tpu.memory_space<vmem>>, vector<16x128xf32>
    %35 = arith.addf %33, %34 : vector<16x128xf32>
    %cst_36 = arith.constant 0.000000e+00 : f32
    %36 = vector.broadcast %cst_36 : f32 to vector<16x128xf32>
    %37 = arith.cmpf oge, %35, %36 : vector<16x128xf32>
    %cst_37 = arith.constant 0.00999999977 : f32
    %38 = vector.broadcast %cst_37 : f32 to vector<16x128xf32>
    %39 = arith.mulf %38, %35 : vector<16x128xf32>
    %40 = arith.select %37, %35, %39 : vector<16x128xi1>, vector<16x128xf32>
    %c8_38 = arith.constant 8 : index
    %c0_39 = arith.constant 0 : index
    %41 = vector.load %arg9[%c8_38, %c0_39] : memref<32x128xf32, #tpu.memory_space<vmem>>, vector<16x128xf32>
    tpu.vector_store %arg9[%c8_38, %c0_39], %40 {strides = array<i32>} : memref<32x128xf32, #tpu.memory_space<vmem>>, vector<16x128xf32>,
    %c7_40 = arith.constant 7 : index
    %c0_41 = arith.constant 0 : index
    %42 = vector.load %arg9[%c7_40, %c0_41] : memref<32x128xf32, #tpu.memory_space<vmem>>, vector<16x128xf32>
    %c8_42 = arith.constant 8 : index
    %c0_43 = arith.constant 0 : index
    %43 = vector.load %arg9[%c8_42, %c0_43] : memref<32x128xf32, #tpu.memory_space<vmem>>, vector<16x128xf32>
    %c9_44 = arith.constant 9 : index
    %c0_45 = arith.constant 0 : index
    %44 = vector.load %arg9[%c9_44, %c0_45] : memref<32x128xf32, #tpu.memory_space<vmem>>, vector<16x128xf32>
    %45 = tpu.concatenate %42, %43, %44 in 1 : vector<16x128xf32>, vector<16x128xf32>, vector<16x128xf32> -> vector<16x384xf32>
    %46 = arith.truncf %45 : vector<16x384xf32> to vector<16x384xbf16>
    %c0_46 = arith.constant 0 : index
    %c0_47 = arith.constant 0 : index
    %47 = vector.load %arg4[%c0_46, %c0_47] : memref<384x64xbf16, #tpu.memory_space<vmem>>, vector<384x64xbf16>
    %cst_48 = arith.constant dense<0.000000e+00> : vector<16x64xf32>
    %48 = tpu.matmul %46, %47, %cst_48 {dimension_numbers = #tpu.dot_dimension_numbers<[1], [0], [0], [1], [0, 0, 1, 1], [], []>} : vector<16x384xbf16>, vector<384x64xbf16>, vector<16x64xf32> -> vector<16x64xf32>
    %c0_49 = arith.constant 0 : index
    %c0_50 = arith.constant 0 : index
    %49 = vector.load %arg7[%c0_49, %c0_50] : memref<1x64xf32, #tpu.memory_space<vmem>>, vector<1x64xf32>
    %50 = vector.broadcast %49 : vector<1x64xf32> to vector<16x64xf32>
    %51 = arith.addf %48, %50 : vector<16x64xf32>
    %cst_51 = arith.constant -1.000000e+00 : f32
    %cst_52 = arith.constant 1.000000e+00 : f32
    %52 = vector.broadcast %cst_51 : f32 to vector<16x64xf32>
    %53 = arith.maximumf %52, %51 : vector<16x64xf32>
    %54 = vector.broadcast %cst_52 : f32 to vector<16x64xf32>
    %55 = arith.minimumf %54, %53 : vector<16x64xf32>
    %c0_53 = arith.constant 0 : index
    %c0_54 = arith.constant 0 : index
    %c0_55 = arith.constant 0 : index
    %56 = vector.load %arg8[%c0_53, %c0_54, %c0_55] : memref<1x16x64xf32, #tpu.memory_space<vmem>>, vector<1x16x64xf32>
    %57 = vector.shape_cast %56 : vector<1x16x64xf32> to vector<16x64xf32>
    %58 = vector.shape_cast %55 : vector<16x64xf32> to vector<1x16x64xf32>
    tpu.vector_store %arg8[%c0_53, %c0_54, %c0_55], %58 {strides = array<i32>} : memref<1x16x64xf32, #tpu.memory_space<vmem>>, vector<1x16x64xf32>,
    return
  }
  func.func @transform_0(%arg0: i32) -> (i32, i32, i32) {
    %c0_i32 = arith.constant 0 : i32
    %c0_i32_0 = arith.constant 0 : i32
    %c0_i32_1 = arith.constant 0 : i32
    return %arg0, %c0_i32, %c0_i32_0 : i32, i32, i32
  }
  func.func @transform_1(%arg0: i32) -> (i32, i32) {
    %c0_i32 = arith.constant 0 : i32
    %c0_i32_0 = arith.constant 0 : i32
    %c0_i32_1 = arith.constant 0 : i32
    return %c0_i32, %c0_i32_0 : i32, i32
  }
  func.func @transform_2(%arg0: i32) -> (i32, i32) {
    %c0_i32 = arith.constant 0 : i32
    %c0_i32_0 = arith.constant 0 : i32
    %c0_i32_1 = arith.constant 0 : i32
    return %c0_i32, %c0_i32_0 : i32, i32
  }
  func.func @transform_3(%arg0: i32) -> (i32, i32) {
    %c0_i32 = arith.constant 0 : i32
    %c0_i32_0 = arith.constant 0 : i32
    %c0_i32_1 = arith.constant 0 : i32
    return %c0_i32, %c0_i32_0 : i32, i32
  }
  func.func @transform_4(%arg0: i32) -> (i32, i32) {
    %c0_i32 = arith.constant 0 : i32
    %c0_i32_0 = arith.constant 0 : i32
    %c0_i32_1 = arith.constant 0 : i32
    return %c0_i32, %c0_i32_0 : i32, i32
  }
  func.func @transform_5(%arg0: i32) -> (i32, i32) {
    %c0_i32 = arith.constant 0 : i32
    %c0_i32_0 = arith.constant 0 : i32
    %c0_i32_1 = arith.constant 0 : i32
    return %c0_i32, %c0_i32_0 : i32, i32
  }
  func.func @transform_6(%arg0: i32) -> (i32, i32) {
    %c0_i32 = arith.constant 0 : i32
    %c0_i32_0 = arith.constant 0 : i32
    %c0_i32_1 = arith.constant 0 : i32
    return %c0_i32, %c0_i32_0 : i32, i32
  }
  func.func @transform_7(%arg0: i32) -> (i32, i32, i32) {
    %c0_i32 = arith.constant 0 : i32
    %c0_i32_0 = arith.constant 0 : i32
    %c0_i32_1 = arith.constant 0 : i32
    return %arg0, %c0_i32, %c0_i32_0 : i32, i32, i32
  }
}

</mosaic_0001>

<bundles_post_ra>
// kernel: filter_iden_forward.1
= control target key start
LH: loop header
LB: loop body
LE: loop exit
PB: predicated region body
PF: predicated region fallthrough
CT: control target
= control target key end

     0   :  { %s1423_s24 = smov 0   ;;  %s1689_s0 = inlined_call_operand.vmem [shape: f32[2,16,64], index: 0, kind: input, shape index: {}]   ;;  %s1690_s1 = inlined_call_operand.vmem [shape: bf16[192,128], index: 1, kind: input, shape index: {}]   ;;  %s1691_s2 = inlined_call_operand.vmem [shape: bf16[384,128], index: 2, kind: input, shape index: {}]   ;;  %s1692_s3 = inlined_call_operand.vmem [shape: bf16[384,64], index: 3, kind: input, shape index: {}]   ;;  %s1693_s4 = inlined_call_operand.vmem [shape: f32[1,128], index: 4, kind: input, shape index: {}]   ;;  %s1694_s5 = inlined_call_operand.vmem [shape: f32[1,128], index: 5, kind: input, shape index: {}]   ;;  %s1695_s6 = inlined_call_operand.vmem [shape: f32[1,64], index: 6, kind: input, shape index: {}]   ;;  %s1696_s7 = inlined_call_operand.vmem [shape: f32[2,16,64], index: 7, kind: output, shape index: {}]  }
   0x1 LB: > { %s1113_s25 = sadd.s32 4294967295, %s1377_s24   ;;  %p1117_p0 = scmp.ge.s32.totalorder %s1377_s24, 1  ;;  %s1377_s24 = sphi %s1423_s24, %s17_s24  }
   0x2   : > { %p237_p1 = scmp.lt.s32.totalorder %s1377_s24, 3 }
   0x4   : > { %p238_p2 = pnand %p1117_p0, %p237_p1 }
   0x5   : > { %p269_p3 = scmp.lt.s32.totalorder (!%p238_p2), %s1113_s25, 1  ;;  %v1379_v0 = vmov (!%p238_p2), 0   ;;  %v1311_v1 = vld [vmem:[%s1690_s1] sm:$0xff] (!%p238_p2)   ;;  %v1380_v2 = vmov (!%p238_p2), 0.0   ;;  %v1312_v3 = vld [vmem:[%s1690_s1 + $0x8] sm:$0xff] (!%p238_p2)   ;;  %vm286_vm0 = vcmask (!%p238_p2), 523264  }
   0x6   : > { %241 = sbr.rel (%p238_p2) target bundleno = 864 (0x360), region = 48  ;;  %413 = vmatprep.subr.bf16.mxu0 (!%p238_p2), %v1379_v0  ;;  %281 = vst [vmem:[#allocation2 + $0x18] sm:$0xff] (!%p238_p2), %v1380_v2  ;;  %280 = vst [vmem:[#allocation2] sm:$0xff] (!%p238_p2), %v1380_v2  ;;  %v1313_v6 = vld [vmem:[%s1690_s1 + $0x10] sm:$0xff] (!%p238_p2)   ;;  %v1314_v7 = vld [vmem:[%s1690_s1 + $0x18] sm:$0xff] (!%p238_p2)   ;;  %s1381_s19 = smov (!%p238_p2), 64  }
   0x7   : > { %282 = vst [vmem:[#allocation3] sm:$0xff] (!%p238_p2), %v1380_v2  ;;  %283 = vst [vmem:[#allocation3 + $0x18] sm:$0xff] (!%p238_p2), %v1380_v2  ;;  %414 = vmatpush1.bf16.msra.mxu0 (!%p238_p2), %v1311_v1  ;;  %v1315_v12 = vld [vmem:[%s1690_s1 + $0x20] sm:$0xff] (!%p238_p2)   ;;  %v1316_v16 = vld [vmem:[%s1690_s1 + $0x28] sm:$0xff] (!%p238_p2)   ;;  %vm1382_vm3 = vmmov (!%p238_p2), 0  }
   0x8   : > { %415 = vmatprep.subr.bf16.mxu0 (!%p238_p2), %v1379_v0  ;;  %v1323_v15 = vld [vmem:[%s1691_s2 + $0x40] sm:$0xff] (!%p238_p2)   ;;  %v1325_v18 = vld [vmem:[%s1691_s2 + $0x48] sm:$0xff] (!%p238_p2)   ;;  %v1327_v20 = vld [vmem:[%s1691_s2 + $0x50] sm:$0xff] (!%p238_p2)  }
   0x9   : > { %v1324_v17 = vld [vmem:[%s1691_s2] sm:$0xff] (!%p238_p2)   ;;  %1192 = vmatprep.subr.bf16.mxu1 (!%p238_p2), %v1323_v15  ;;  %v1326_v19 = vld [vmem:[%s1691_s2 + $0x8] sm:$0xff] (!%p238_p2)   ;;  %v1317_v21 = vld [vmem:[%s1690_s1 + $0x30] sm:$0xff] (!%p238_p2)  }
   0xa   : > { %1193 = vmatpush3.bf16.msra.mxu1 (!%p238_p2), %v1324_v17  ;;  %v1328_v22 = vld [vmem:[%s1691_s2 + $0x10] sm:$0xff] (!%p238_p2)   ;;  %v1329_v23 = vld [vmem:[%s1691_s2 + $0x58] sm:$0xff] (!%p238_p2)   ;;  %v1319_v26 = vld [vmem:[%s1690_s1 + $0x40] sm:$0xff] (!%p238_p2)  }
   0xb   : > { %416 = vmatpush1.bf16.msra.mxu0 (!%p238_p2), %v1312_v3  ;;  %1194 = vmatprep.subr.bf16.mxu1 (!%p238_p2), %v1325_v18  ;;  %v1318_v24 = vld [vmem:[%s1690_s1 + $0x38] sm:$0xff] (!%p238_p2)   ;;  %v1320_v27 = vld [vmem:[%s1690_s1 + $0x48] sm:$0xff] (!%p238_p2)   ;;  %v1321_v28 = vld [vmem:[%s1690_s1 + $0x50] sm:$0xff] (!%p238_p2)  }
   0xc   : > { %417 = vmatprep.subr.bf16.mxu0 (!%p238_p2), %v1379_v0  ;;  %v1330_v25 = vld [vmem:[%s1691_s2 + $0x18] sm:$0xff] (!%p238_p2)   ;;  %v1331_v38 = vld [vmem:[%s1691_s2 + $0x60] sm:$0xff] (!%p238_p2)   ;;  %v1333_v40 = vld [vmem:[%s1691_s2 + $0x68] sm:$0xff] (!%p238_p2)  }
   0xd   : > { %s1698_s25 = smov (!%p269_p3, %s1113_s25), 1  ;;  %v1322_v29 = vld [vmem:[%s1690_s1 + $0x58] sm:$0xff]   ;;  %v1332_v39 = vld [vmem:[%s1691_s2 + $0x20] sm:$0xff]   ;;  %v1334_v41 = vld [vmem:[%s1691_s2 + $0x28] sm:$0xff]  }
   0xe   : > { %s1190_s30 = sshll.u32 %s1698_s25, 4  ;;  %1195 = vmatpush3.bf16.msra.mxu1 %v1326_v19  ;;  %v1335_v42 = vld [vmem:[%s1691_s2 + $0x70] sm:$0xff]   ;;  %v1337_v44 = vld [vmem:[%s1691_s2 + $0x78] sm:$0xff]   ;;  %v1122_v46 = vld [vmem:[%s1693_s4] ss:$0 sm:$0xff] }
   0xf   : > { %s273_s10 = scalar_lea.vmem %s1689_s0, %s1190_s30  ;;  %418 = vmatpush1.bf16.msra.mxu0 %v1313_v6  ;;  %1196 = vmatprep.subr.bf16.mxu1 %v1327_v20  ;;  %v1336_v43 = vld [vmem:[%s1691_s2 + $0x30] sm:$0xff]   ;;  %v1338_v45 = vld [vmem:[%s1691_s2 + $0x38] sm:$0xff]   ;;  %v1339_v60 = vld [vmem:[%s1691_s2 + $0x80] sm:$0xff]   ;;  %s278_s16 = scalar_lea.vmem %s1696_s7, %s1190_s30 }
  0x10   : > { %v284_v4 = vld [vmem:[%s273_s10] sm:$0xff]  ;;  %v285_v5 = vld [vmem:[%s273_s10 + $0x8] sm:$0xff]  ;;  %419 = vmatprep.subr.bf16.mxu0 %v1379_v0  ;;  %v1341_v63 = vld [vmem:[%s1691_s2 + $0x90] sm:$0xff]  }
  0x11   : > { %287 = vst.msk [vmem:[#allocation2 + $0x8] sm:$0xff] %vm286_vm0, %v284_v4  ;;  %288 = vst.msk [vmem:[#allocation2 + $0x10] sm:$0xff] %vm286_vm0, %v285_v5  ;;  %v1340_v62 = vld [vmem:[%s1691_s2 + $0x88] sm:$0xff]   ;;  %v1343_v1 = vld [vmem:[%s1691_s2 + $0xa0] sm:$0xff]  }
  0x12   : > { %1197 = vmatpush3.bf16.msra.mxu1 %v1328_v22  ;;  %v1344_v3 = vld [vmem:[%s1691_s2 + $0xa8] sm:$0xff]   ;;  %v1345_v4 = vld [vmem:[%s1691_s2 + $0xb0] sm:$0xff]   ;;  %v1346_v5 = vld [vmem:[%s1691_s2 + $0xb8] sm:$0xff]  }
  0x13   : > { %420 = vmatpush1.bf16.msra.mxu0 %v1314_v7  ;;  %1198 = vmatprep.subr.bf16.mxu1 %v1329_v23  ;;  %v1353_v15 = vld [vmem:[%s1692_s3 + $0x50] sm:$0xff]   ;;  %v1356_v18 = vld [vmem:[%s1692_s3 + $0x58] sm:$0xff]   ;;  %v1360_v22 = vld [vmem:[%s1692_s3 + $0xa0] sm:$0xff]  }
  0x14   : > { %421 = vmatprep.subr.bf16.mxu0 %v1379_v0  ;;  %v1355_v17 = vld [vmem:[%s1692_s3 + $0x10] sm:$0xff]   ;;  %v1357_v19 = vld [vmem:[%s1692_s3 + $0x98] sm:$0xff]   ;;  %v1361_v23 = vld [vmem:[%s1692_s3 + $0x20] sm:$0xff]  }
  0x15   : > { %v1358_v20 = vld [vmem:[%s1692_s3 + $0x18] sm:$0xff]  }
  0x16   : > { %1199 = vmatpush3.bf16.msra.mxu1 %v1330_v25  ;;  %v1363_v25 = vld [vmem:[%s1692_s3 + $0xa8] sm:$0xff]  }
  0x17   : > { %422 = vmatpush1.bf16.msra.mxu0 %v1315_v12  ;;  %1200 = vmatprep.subr.bf16.mxu1 %v1331_v38  ;;  %v1350_v12 = vld [vmem:[%s1692_s3 + $0x48] sm:$0xff]  }
  0x18   : > { %v291_v8 = vld [vmem:[#allocation2 + $0x8] sm:$0xff]  ;;  %v292_v9 = vld [vmem:[#allocation2 + $0x10] sm:$0xff]  ;;  %423 = vmatprep.subr.bf16.mxu0 %v1379_v0 }
  0x19   : > { %v293_v10 = vld [vmem:[#allocation2 + $0x9] sm:$0xff]  ;;  %v1306_v11 = vpack.i.bf16 %v292_v9, %v291_v8  ;;  %v294_v13 = vld [vmem:[#allocation2 + $0x11] sm:$0xff]  ;;  %v1347_v9 = vld [vmem:[%s1692_s3 + $0x40] sm:$0xff]  }
  0x1a   : > { %v306_v14 = vpack.c.bf16 %v294_v13, %v293_v10  ;;  %v289_v31 = vld [vmem:[#allocation2 + $0x7] sm:$0xff]  ;;  %v290_v32 = vld [vmem:[#allocation2 + $0xf] sm:$0xff]  ;;  %1201 = vmatpush3.bf16.msra.mxu1 %v1332_v39  ;;  %v1136_v39 = vld [vmem:[%s1694_s5] ss:$0 sm:$0xff] }
  0x1b   : > { %1307 = vrot.lane.b32.xlu0 %v1306_v11, %s1381_s19  ;;  %424 = vmatpush1.bf16.msra.mxu0 %v1316_v16  ;;  %v1348_v10 = vld [vmem:[%s1692_s3 + $0x80] sm:$0xff]   ;;  %v1351_v13 = vld [vmem:[%s1692_s3 + $0x88] sm:$0xff]   ;;  %v1354_v16 = vld [vmem:[%s1692_s3 + $0x90] sm:$0xff]  }
  0x1c   : > { %1135 = vmatprep.mubr.msk.bf16.mxu0 %vm286_vm0, %v306_v14  ;;  %425 = vmatprep.subr.bf16.mxu0 %v1379_v0  ;;  %v1349_v11 = vld [vmem:[%s1692_s3] sm:$0xff]   ;;  %v1352_v14 = vld [vmem:[%s1692_s3 + $0x8] sm:$0xff]  }
  0x1d   : > { %1202 = vmatprep.subr.bf16.mxu1 %v1333_v40 }
  0x1e   : > { %1203 = vmatpush3.bf16.msra.mxu1 %v1334_v41 }
  0x1f   : > { %426 = vmatpush1.bf16.msra.mxu0 %v1317_v21  ;;  %1204 = vmatprep.subr.bf16.mxu1 %v1335_v42  ;;  %v1359_v21 = vld [vmem:[%s1692_s3 + $0x60] sm:$0xff]  }
  0x20   : > { %427 = vmatprep.subr.bf16.mxu0 %v1379_v0 }
  0x22   : > { %1205 = vmatpush3.bf16.msra.mxu1 %v1336_v43 }
  0x23   : > { %428 = vmatpush1.bf16.msra.mxu0 %v1318_v24  ;;  %1206 = vmatprep.subr.bf16.mxu1 %v1337_v44  ;;  %v1362_v24 = vld [vmem:[%s1692_s3 + $0x68] sm:$0xff]  }
  0x24   : > { %429 = vmatprep.subr.bf16.mxu0 %v1379_v0 }
  0x26   : > { %1207 = vmatpush3.bf16.msra.mxu1 %v1338_v45 }
  0x27   : > { %430 = vmatpush1.bf16.msra.mxu0 %v1319_v26  ;;  %1254 = vmatprep.subr.bf16.mxu1 %v1380_v2  ;;  %v1364_v26 = vld [vmem:[%s1692_s3 + $0x28] sm:$0xff]  }
  0x28   : > { %431 = vmatprep.subr.bf16.mxu0 %v1379_v0 }
  0x2b   : > { %432 = vmatpush1.bf16.msra.mxu0 %v1320_v27  ;;  %v1365_v27 = vld [vmem:[%s1692_s3 + $0x70] sm:$0xff]  }
  0x2c   : > { %433 = vmatprep.subr.bf16.mxu0 %v1379_v0 }
  0x2f   : > { %434 = vmatpush1.bf16.msra.mxu0 %v1321_v28  ;;  %v1366_v28 = vld [vmem:[%s1692_s3 + $0xb0] sm:$0xff]  }
  0x30   : > { %435 = vmatprep.subr.bf16.mxu0 %v1379_v0  ;;  %v1342_v0 = vld [vmem:[%s1691_s2 + $0x98] sm:$0xff]  }
  0x33   : > { %436 = vmatpush1.bf16.msra.mxu0 %v1322_v29  ;;  %v1367_v29 = vld [vmem:[%s1692_s3 + $0x30] sm:$0xff]  }
  0x34   : > { %1223 = vmatprep.subr.bf16.mxu0 %v1347_v9 }
  0x8d   : > { %v1308_v30 = vpop.permute.xlu0 %1307 }
  0x8e   : > { %v1310_v33 = vunpack.i.h.bf16 %v1308_v30  ;;  %v1309_v34 = vunpack.i.l.bf16 %v1308_v30  ;;  %v1368_v30 = vld [vmem:[%s1692_s3 + $0x78] sm:$0xff]  }
  0x90   : > { %v303_v35 = vsel %vm286_vm0, %v289_v31, %v1309_v34  ;;  %v304_v36 = vsel %vm286_vm0, %v290_v32, %v1310_v33  ;;  %v1369_v31 = vld [vmem:[%s1692_s3 + $0xb8] sm:$0xff]  }
  0x91   : > { %v305_v37 = vpack.c.bf16 %v304_v36, %v303_v35  ;;  %v1370_v32 = vld [vmem:[%s1692_s3 + $0x38] sm:$0xff]  }
  0x93   : > { %446 = vmatmul.mubr.bf16.vlgmr.msra.gmra.mrb[0].mxu0 %v305_v37 }
  0x94   : > { %1224 = vmatpush3.bf16.msra.mxu0 %v1349_v11 }
  0x95   : > { %1225 = vmatprep.subr.bf16.mxu0 %v1350_v12 }
  0x98   : > { %1226 = vmatpush3.bf16.msra.mxu0 %v1352_v14 }
  0x99   : > { %1227 = vmatprep.subr.bf16.mxu0 %v1353_v15 }
  0x9c   : > { %1228 = vmatpush3.bf16.msra.mxu0 %v1355_v17 }
  0x9d   : > { %1229 = vmatprep.subr.bf16.mxu0 %v1356_v18 }
  0xa0   : > { %1230 = vmatpush3.bf16.msra.mxu0 %v1358_v20 }
  0xa1   : > { %1231 = vmatprep.subr.bf16.mxu0 %v1359_v21 }
  0xa4   : > { %1232 = vmatpush3.bf16.msra.mxu0 %v1361_v23 }
  0xa5   : > { %1233 = vmatprep.subr.bf16.mxu0 %v1362_v24 }
  0xa8   : > { %1234 = vmatpush3.bf16.msra.mxu0 %v1364_v26 }
  0xa9   : > { %1235 = vmatprep.subr.bf16.mxu0 %v1365_v27 }
  0xac   : > { %1236 = vmatpush3.bf16.msra.mxu0 %v1367_v29 }
  0xad   : > { %1237 = vmatprep.subr.bf16.mxu0 %v1368_v30 }
  0xb0   : > { %1238 = vmatpush3.bf16.msra.mxu0 %v1370_v32 }
 0x166   : > { %v447_v47 = vpop.f32.mrb[0].mxu0 }
 0x167   : > { %v448_v48 = vadd.f32 %v1122_v46, %v447_v47  ;;  %v449_v49 = vpop.f32.mrb[1].mxu0 }
 0x168   : > { %v450_v50 = vpop.f32.mrb[2].mxu0 }
 0x169   : > { %vm454_vm1 = vcmp.ge.f32.partialorder %v448_v48, 0.0  ;;  %v456_v51 = vmul.f32 0.01, %v448_v48  ;;  %v451_v52 = vadd.f32 %v1122_v46, %v450_v50  ;;  %v452_v53 = vpop.f32.mrb[3].mxu0 }
 0x16b   : > { %v1548_v54 = vsel %vm454_vm1, %v448_v48, %v456_v51  ;;  %vm455_vm2 = vcmp.ge.f32.partialorder %v451_v52, 0.0  ;;  %v457_v55 = vmul.f32 0.01, %v451_v52 }
 0x16c   : > { %460 = vst [vmem:[#allocation3 + $0x8] sm:$0xff] %v1548_v54 }
 0x16d   : > { %v1551_v56 = vsel %vm455_vm2, %v451_v52, %v457_v55 }
 0x16e   : > { %461 = vst [vmem:[#allocation3 + $0x10] sm:$0xff] %v1551_v56  ;;  %v469_v57 = vpack.c.bf16 %v1551_v56, %v1548_v54 }
 0x170   : > { %702 = vmatprep.mubr.bf16.mxu1 %v469_v57 }
 0x173   : > { %v462_v58 = vld [vmem:[#allocation3 + $0x7] sm:$0xff] }
 0x175   : > { %v463_v59 = vld [vmem:[#allocation3 + $0xf] sm:$0xff] }
 0x176   : > { %v468_v61 = vpack.c.bf16 %v463_v59, %v462_v58  ;;  %v466_v6 = vld [vmem:[#allocation3 + $0x9] sm:$0xff]  ;;  %v467_v7 = vld [vmem:[#allocation3 + $0x11] sm:$0xff] }
 0x177   : > { %v470_v8 = vpack.c.bf16 %v467_v7, %v466_v6 }
 0x178   : > { %703 = vmatmul.mubr.bf16.vlgmr.msra.gmra.mrb[0].mxu1 %v468_v61 }
 0x179   : > { %1255 = vmatpush3.bf16.msra.mxu1 %v1339_v60  ;;  %1270 = vmatprep.mubr.msk.bf16.mxu1 %vm1382_vm3, %v1380_v2 }
 0x17a   : > { %1256 = vmatprep.subr.bf16.mxu1 %v1380_v2 }
 0x17d   : > { %1257 = vmatpush3.bf16.msra.mxu1 %v1340_v62 }
 0x17e   : > { %1258 = vmatprep.subr.bf16.mxu1 %v1380_v2 }
 0x181   : > { %1259 = vmatpush3.bf16.msra.mxu1 %v1341_v63  ;;  %v1161_v63 = vld [vmem:[%s1695_s6] ss:$0 sm:$0xff] }
 0x182   : > { %1260 = vmatprep.subr.bf16.mxu1 %v1380_v2 }
 0x185   : > { %1261 = vmatpush3.bf16.msra.mxu1 %v1342_v0 }
 0x186   : > { %1262 = vmatprep.subr.bf16.mxu1 %v1380_v2 }
 0x189   : > { %1263 = vmatpush3.bf16.msra.mxu1 %v1343_v1 }
 0x18a   : > { %1264 = vmatprep.subr.bf16.mxu1 %v1380_v2 }
 0x18d   : > { %1265 = vmatpush3.bf16.msra.mxu1 %v1344_v3 }
 0x18e   : > { %1266 = vmatprep.subr.bf16.mxu1 %v1380_v2 }
 0x191   : > { %1267 = vmatpush3.bf16.msra.mxu1 %v1345_v4 }
 0x192   : > { %1268 = vmatprep.subr.bf16.mxu1 %v1380_v2 }
 0x195   : > { %1269 = vmatpush3.bf16.msra.mxu1 %v1346_v5 }
 0x196   : > { %1274 = vmatprep.subr.bf16.mxu1 %v1380_v2 }
 0x198   : > { %1271 = vmatmul.mubr.bf16.vlgmr.msra.gmra.mrb[4].mxu1 %v470_v8 }
 0x199   : > { %1290 = vmatprep.mubr.msk.bf16.mxu1 %vm1382_vm3, %v1380_v2  ;;  %1275 = vmatpush3.bf16.msra.mxu1 %v1348_v10 }
 0x19a   : > { %1276 = vmatprep.subr.bf16.mxu1 %v1380_v2 }
 0x19d   : > { %1277 = vmatpush3.bf16.msra.mxu1 %v1351_v13 }
 0x19e   : > { %1278 = vmatprep.subr.bf16.mxu1 %v1380_v2 }
 0x1a1   : > { %1279 = vmatpush3.bf16.msra.mxu1 %v1354_v16 }
 0x1a2   : > { %1280 = vmatprep.subr.bf16.mxu1 %v1380_v2 }
 0x1a5   : > { %1281 = vmatpush3.bf16.msra.mxu1 %v1357_v19 }
 0x1a6   : > { %1282 = vmatprep.subr.bf16.mxu1 %v1380_v2 }
 0x1a9   : > { %1283 = vmatpush3.bf16.msra.mxu1 %v1360_v22 }
 0x1aa   : > { %1284 = vmatprep.subr.bf16.mxu1 %v1380_v2 }
 0x1ad   : > { %1285 = vmatpush3.bf16.msra.mxu1 %v1363_v25 }
 0x1ae   : > { %1286 = vmatprep.subr.bf16.mxu1 %v1380_v2 }
 0x1b1   : > { %1287 = vmatpush3.bf16.msra.mxu1 %v1366_v28 }
 0x1b2   : > { %1288 = vmatprep.subr.bf16.mxu1 %v1380_v2 }
 0x1b5   : > { %1289 = vmatpush3.bf16.msra.mxu1 %v1369_v31 }
 0x24b   : > { %v1208_v33 = vpop.f32.mrb[0].mxu1 }
 0x24c   : > { %v1209_v34 = vpop.f32.mrb[1].mxu1 }
 0x24d   : > { %v1210_v35 = vadd.f32 %v1209_v34, %v1208_v33  ;;  %v1211_v36 = vpop.f32.mrb[2].mxu1 }
 0x24e   : > { %v1212_v37 = vpop.f32.mrb[3].mxu1 }
 0x24f   : > { %v1213_v38 = vadd.f32 %v1212_v37, %v1211_v36  ;;  %v705_v40 = vadd.f32 %v1210_v35, %v1136_v39 }
 0x251   : > { %v708_v44 = vadd.f32 %v1213_v38, %v1136_v39 }
 0x26b   : > { %v745_v41 = vpop.f32.mrb[4].mxu1 }
 0x26c   : > { %v746_v42 = vadd.f32 %v745_v41, %v705_v40  ;;  %v1272_v43 = vpop.f32.mrb[5].mxu1 }
 0x26d   : > { %v748_v45 = vpop.f32.mrb[6].mxu1 }
 0x26e   : > { %v752_v2 = vadd.f32 %v746_v42, %v1548_v54  ;;  %v749_v46 = vadd.f32 %v748_v45, %v708_v44  ;;  %v1273_v47 = vpop.f32.mrb[7].mxu1 }
 0x270   : > { %vm754_vm4 = vcmp.ge.f32.partialorder %v752_v2, 0.0  ;;  %v756_v48 = vmul.f32 0.01, %v752_v2  ;;  %v753_v49 = vadd.f32 %v749_v46, %v1551_v56 }
 0x272   : > { %v758_v50 = vsel %vm754_vm4, %v752_v2, %v756_v48  ;;  %vm755_vm5 = vcmp.ge.f32.partialorder %v753_v49, 0.0  ;;  %v757_v51 = vmul.f32 0.01, %v753_v49 }
 0x273   : > { %760 = vst [vmem:[#allocation2 + $0x8] sm:$0xff] %v758_v50 }
 0x274   : > { %v759_v52 = vsel %vm755_vm5, %v753_v49, %v757_v51 }
 0x275   : > { %761 = vst [vmem:[#allocation2 + $0x10] sm:$0xff] %v759_v52  ;;  %v769_v53 = vpack.c.bf16 %v759_v52, %v758_v50 }
 0x277   : > { %1002 = vmatprep.mubr.bf16.mxu0 %v769_v53 }
 0x27a   : > { %v762_v55 = vld [vmem:[#allocation2 + $0x7] sm:$0xff] }
 0x27c   : > { %v766_v57 = vld [vmem:[#allocation2 + $0x9] sm:$0xff]  ;;  %v767_v58 = vld [vmem:[#allocation2 + $0x11] sm:$0xff] }
 0x27d   : > { %v763_v59 = vld [vmem:[#allocation2 + $0xf] sm:$0xff]  ;;  %v770_v60 = vpack.c.bf16 %v767_v58, %v766_v57 }
 0x27e   : > { %v768_v54 = vpack.c.bf16 %v763_v59, %v762_v55 }
 0x27f   : > { %1291 = vmatmul.mubr.bf16.vlgmr.msra.gmra.mrb[8].mxu1 %v770_v60 }
 0x280   : > { %1003 = vmatmul.mubr.bf16.vlgmr.msra.gmra.mrb[4].mxu0 %v768_v54 }
 0x352   : > { %v1045_v61 = vpop.f32.mrb[8].mxu1 }
 0x353   : > { %v1239_v62 = vpop.f32.mrb[4].mxu0  ;;  %v1292_v56 = vpop.f32.mrb[9].mxu1 }
 0x354   : > { %v1240_v0 = vpop.f32.mrb[5].mxu0  ;;  %v1048_v3 = vpop.f32.mrb[10].mxu1 }
 0x355   : > { %v1241_v1 = vadd.f32 %v1240_v0, %v1239_v62  ;;  %v1242_v4 = vpop.f32.mrb[6].mxu0  ;;  %v1293_v5 = vpop.f32.mrb[11].mxu1 }
 0x356   : > { %v1243_v6 = vpop.f32.mrb[7].mxu0 }
 0x357   : > { %v1005_v7 = vadd.f32 %v1241_v1, %v1161_v63  ;;  %v1244_v8 = vadd.f32 %v1243_v6, %v1242_v4 }
 0x359   : > { %v1046_v9 = vadd.f32 %v1045_v61, %v1005_v7  ;;  %v1008_v10 = vadd.f32 %v1244_v8, %v1161_v63 }
 0x35b   : > { %v1186_v11 = vclamps-f32 %v1046_v9, 1.0  ;;  %v1049_v12 = vadd.f32 %v1048_v3, %v1008_v10 }
 0x35d   : > { %1056 = vst.msk [vmem:[%s278_s16] sm:$0xff] %vm286_vm0, %v1186_v11  ;;  %v1187_v13 = vclamps-f32 %v1049_v12, 1.0 }
 0x35f   : > { %1057 = vst.msk [vmem:[%s278_s16 + $0x8] sm:$0xff] %vm286_vm0, %v1187_v13 }
 0x360 PF: > { %s17_s24 = sadd.s32 1, %s1377_s24  }
 0x361   : > { %p14_p4 = scmp.ge.s32.totalorder %s17_s24, 4  }
 0x363   :  { %16 = sbr.rel (!%p14_p4) target bundleno = 1 (0x1), region = 78 }

</bundles_post_ra>
